<compile_context>
chip_gen: v7x
topology: tpu7x:2x2x1
jax: 0.10.0
libtpu: 0.0.40
codegen_flags: <defaults>
</compile_context>

<pallas_src>
import functools

import jax
import jax.numpy as jnp
from jax.experimental import pallas as pl
from jax.experimental.pallas import tpu as pltpu


# ----------------------------------------------------------------------------
# Kernels
# ----------------------------------------------------------------------------

def _flat_kernel(x_ref, mask_ref, constr_ref, out_ref, *,
                 total_rows, num_constraints, compute_dtype):
    """Lane-dense path: constr tile is [TB, K*C] (used when C < 128)."""
    tb = x_ref.shape[0]
    kc = constr_ref.shape[1]
    k = num_constraints

    # Softmax numerator / denominator in f32 (exp runs on the EUP).
    x = x_ref[...].astype(jnp.float32)                        # [TB, C]
    m = jnp.max(x, axis=-1, keepdims=True)                    # [TB, 1]
    e = jnp.exp(x - m)                                         # [TB, C]
    denom = jnp.sum(e, axis=-1, keepdims=True)                 # [TB, 1]

    # Lane-dense weight  w[b, j*C + c] = mask[b, j] * e[b, c], built from the
    # small per-row factors only (no relayout of the big array).
    e_c = e.astype(compute_dtype)                              # [TB, C]
    mask_c = mask_ref[...].astype(compute_dtype)               # [TB, K]
    w = jnp.concatenate([e_c * mask_c[:, j:j + 1] for j in range(k)], axis=-1)

    constr = constr_ref[...]
    if constr.dtype != compute_dtype:
        constr = constr.astype(compute_dtype)
    prod = constr * w                                          # [TB, K*C] big multiply

    # XLU-lean reduction: add 128-lane chunks elementwise on the VPU first, then
    # a single cross-lane reduce per row (f32 accumulation).
    if kc > 128 and kc % 128 == 0:
        acc = prod[:, 0:128].astype(jnp.float32)
        for i in range(1, kc // 128):
            acc = acc + prod[:, i * 128:(i + 1) * 128].astype(jnp.float32)
    else:
        acc = prod.astype(jnp.float32)
    s = jnp.sum(acc, axis=-1, keepdims=True)                   # [TB, 1]

    out = jnp.clip(s / denom, 0.0, 1.0)                        # [TB, 1]

    # Ragged-tail guard: rows past the true batch are garbage (constr is never
    # padded in the wrapper) -> force them to 0 before the store.
    row = (pl.program_id(0) * tb
           + jax.lax.broadcasted_iota(jnp.int32, (tb, 1), 0))
    out_ref[...] = jnp.where(row < total_rows, out, 0.0)


def _blocked3d_kernel(x_ref, mask_ref, constr_ref, out_ref, *,
                      total_rows, compute_dtype):
    """Fallback path: constr tile stays [TB, K, C] (C already lane-dense)."""
    tb = x_ref.shape[0]

    x = x_ref[...].astype(jnp.float32)                         # [TB, C]
    mask = mask_ref[...].astype(jnp.float32)                   # [TB, K]
    m = jnp.max(x, axis=-1, keepdims=True)
    e = jnp.exp(x - m)                                          # [TB, C]
    denom = jnp.sum(e, axis=-1, keepdims=True)                  # [TB, 1]

    constr = constr_ref[...]
    if constr.dtype != compute_dtype:
        constr = constr.astype(compute_dtype)
    e_c = e.astype(compute_dtype)

    # Lane(C)-axis reduce per constraint row, then mask-weighted sum over K.
    prod = (constr * e_c[:, None, :]).astype(jnp.float32)       # [TB, K, C]
    per_k = jnp.sum(prod, axis=-1)                              # [TB, K]
    s = jnp.sum(per_k * mask, axis=-1, keepdims=True)           # [TB, 1]

    out = jnp.clip(s / denom, 0.0, 1.0)
    row = (pl.program_id(0) * tb
           + jax.lax.broadcasted_iota(jnp.int32, (tb, 1), 0))
    out_ref[...] = jnp.where(row < total_rows, out, 0.0)


# ----------------------------------------------------------------------------
# Wrapper
# ----------------------------------------------------------------------------

def _round_up(n, m):
    return ((n + m - 1) // m) * m


def _vmem_capacity_bytes():
    """Per-TensorCore VMEM capacity; conservative (v7x, 64 MiB) fallback."""
    try:
        cap = getattr(pltpu.get_tpu_info(), "vmem_capacity_bytes", None)
        if cap:
            return int(cap)
    except Exception:
        pass
    return 64 << 20


def _has_native_bf16_vpu():
    """bf16 VPU exists on v6e / v7x; v5e and older should keep f32 math."""
    try:
        kind = jax.devices()[0].device_kind.lower()
    except Exception:
        return False
    return not any(t in kind for t in ("v2", "v3", "v4", "v5"))


def _choose_batch_tile(b, K, C, itemsize, vmem_cap):
    """Largest batch tile whose per-step footprint fits ~0.35x of VMEM.

    Per-row model: double-buffered constr tile in its native dtype plus the
    live compute-dtype / f32 intermediates (~12 B/element), plus small tiles.
    """
    per_row = K * C * (2 * itemsize + 12) + 16 * (K + C) + 512
    budget = max(int(0.35 * vmem_cap), 8 << 20)
    tb = max(budget // per_row, 8)
    tb = (tb // 8) * 8
    row_bytes = max(K * C * itemsize, 1)

    if tb >= b:
        tb = b  # whole batch fits as one resident block
        # Still split when there is enough data to pipeline DMA with compute
        # (and to give a second TensorCore something to share).
        if b >= 32 and b * row_bytes >= (4 << 20):
            cand = _round_up(pl.cdiv(b, 4), 8)
            if cand < b:
                tb = cand
    else:
        # Keep >= ~4 grid steps while each constr buffer stays >= ~1 MiB.
        if pl.cdiv(b, tb) < 4:
            cand = _round_up(pl.cdiv(b, 4), 8)
            if cand * row_bytes >= (1 << 20) and cand < b:
                tb = min(tb, cand)
    return max(tb, 1)


@functools.partial(jax.jit, static_argnames=("tb",))
def ent_in_set(x, mask, constr, *, tb=None):
    """x: [B, C] logits, mask: [B, K] bool, constr: [B, K, C] -> [B] f32 in [0,1]."""
    assert mask.shape[1] == constr.shape[1], \
        "invalid dimension between constraint and relative mask"
    B, C = x.shape
    K = mask.shape[1]
    assert constr.shape == (B, K, C), "input tensor dimension is wrong"

    vmem_cap = _vmem_capacity_bytes()
    itemsize = jnp.dtype(constr.dtype).itemsize

    # bf16 big-multiply (f32 accumulation) only where the VPU is natively bf16.
    use_bf16 = (constr.dtype == jnp.bfloat16) and _has_native_bf16_vpu()
    compute_dtype = jnp.bfloat16 if use_bf16 else jnp.float32

    if tb is None:
        tb = _choose_batch_tile(B, K, C, itemsize, vmem_cap)
    else:
        tb = max(int(tb), 1)
        if tb >= B:
            tb = B
        elif tb % 8 != 0:
            tb = min(max((tb // 8) * 8, 8), B)

    grid = (pl.cdiv(B, tb),)
    mask_f = mask.astype(jnp.float32)  # tiny; cast in the wrapper

    # Lane-dense path when C is narrow (full 128-lane occupancy on the big array).
    use_flat = (C < 128) and (K <= 256) and (K * C <= 8192)

    compiler_params = pltpu.CompilerParams(
        # TODO(synk): on v7x, sweep pltpu.CORE_PARALLEL here to split the batch
        # grid across both TensorCores explicitly (no effect on v5e/v6e).
        dimension_semantics=("parallel",),
        vmem_limit_bytes=min(max(int(0.7 * vmem_cap), 32 << 20), 110 << 20),
    )

    if use_flat:
        constr_in = constr.reshape(B, K * C)   # contiguous minor dims -> free
        kernel = functools.partial(
            _flat_kernel, total_rows=B, num_constraints=K,
            compute_dtype=compute_dtype)
        constr_spec = pl.BlockSpec((tb, K * C), lambda i: (i, 0))
    else:
        constr_in = constr
        kernel = functools.partial(
            _blocked3d_kernel, total_rows=B, compute_dtype=compute_dtype)
        constr_spec = pl.BlockSpec((tb, K, C), lambda i: (i, 0, 0))

    out2d = pl.pallas_call(
        kernel,
        out_shape=jax.ShapeDtypeStruct((B, 1), jnp.float32),
        grid=grid,
        in_specs=[
            pl.BlockSpec((tb, C), lambda i: (i, 0)),   # x
            pl.BlockSpec((tb, K), lambda i: (i, 0)),   # mask (f32, tiny)
            constr_spec,                               # constr (native dtype)
        ],
        out_specs=pl.BlockSpec((tb, 1), lambda i: (i, 0)),
        compiler_params=compiler_params,
    )(x, mask_f, constr_in)

    return out2d[:, 0]


def ent_in_set_ref(x, mask, constr):
    """Pure-JAX reference of the PyTorch forward."""
    probs = jax.nn.softmax(x.astype(jnp.float32), axis=1)
    w = mask.astype(jnp.float32)[:, :, None]                   # [B, K, 1]
    out = jnp.sum(probs[:, None, :] * constr.astype(jnp.float32) * w,
                  axis=(1, 2))
    return jnp.clip(out, 0.0, 1.0)


if __name__ == "__main__":
    key = jax.random.PRNGKey(0)
    k1, k2, k3, k4, k5, k6 = jax.random.split(key, 6)

    # --- Test 1: small-C lane-dense path, bf16 constr, ragged batch tail -----
    B, K, C = 19, 8, 16
    x = jax.random.normal(k1, (B, C), dtype=jnp.float32)
    mask = jax.random.bernoulli(k2, p=0.5, shape=(B, K))
    constr = jax.random.bernoulli(k3, p=0.3, shape=(B, K, C)).astype(jnp.bfloat16)

    out = jax.block_until_ready(ent_in_set(x, mask, constr, tb=8))
    ref = ent_in_set_ref(x, mask, constr)
    assert out.shape == (B,)
    assert bool(jnp.all(out >= 0.0)) and bool(jnp.all(out <= 1.0))
    # bf16 big-multiply path: softmax numerators rounded to bf16 (<= ~2^-8 rel).
    assert jnp.allclose(out, ref, atol=5e-3, rtol=5e-3), (out, ref)

    # --- Test 2: large-C 3-D path, f32 constr, ragged tail --------------------
    B2, K2, C2 = 9, 4, 128
    x2 = jax.random.normal(k4, (B2, C2), dtype=jnp.float32)
    mask2 = jax.random.bernoulli(k5, p=0.5, shape=(B2, K2))
    constr2 = jax.random.uniform(k6, (B2, K2, C2), dtype=jnp.float32)

    out2 = jax.block_until_ready(ent_in_set(x2, mask2, constr2, tb=8))
    ref2 = ent_in_set_ref(x2, mask2, constr2)
    assert out2.shape == (B2,)
    assert bool(jnp.all(out2 >= 0.0)) and bool(jnp.all(out2 <= 1.0))
    assert jnp.allclose(out2, ref2, atol=1e-4, rtol=1e-4), (out2, ref2)

    print("KERNEL_OK")
</pallas_src>

<mosaic_0001>
module attributes {stable_mosaic.version = 11 : i64} {
  func.func @_flat_kernel(%arg0: i32, %arg1: memref<8x16xf32, #tpu.memory_space<vmem>>, %arg2: memref<8x8xf32, #tpu.memory_space<vmem>>, %arg3: memref<8x128xbf16, #tpu.memory_space<vmem>>, %arg4: memref<8x1xf32, #tpu.memory_space<vmem>>) attributes {dimension_semantics = [#tpu.dimension_semantics<parallel>], iteration_bounds = array<i64: 3>, scalar_prefetch = 0 : i64, scratch_operands = 0 : i64, tpu.core_type = #tpu.core_type<tc>, window_params = [{transform_indices = @transform_0, window_bounds = array<i64: 8, 16>}, {transform_indices = @transform_1, window_bounds = array<i64: 8, 8>}, {transform_indices = @transform_2, window_bounds = array<i64: 8, 128>}, {transform_indices = @transform_3, window_bounds = array<i64: 8, 1>}]} {
    %c0 = arith.constant 0 : index
    %c0_0 = arith.constant 0 : index
    %0 = vector.load %arg1[%c0, %c0_0] : memref<8x16xf32, #tpu.memory_space<vmem>>, vector<8x16xf32>
    %cst = arith.constant dense<0xFF800000> : vector<8xf32>
    %1 = vector.multi_reduction <maximumf>, %0, %cst [1] : vector<8x16xf32> to vector<8xf32>
    %2 = vector.shape_cast %1 : vector<8xf32> to vector<8x1xf32>
    %3 = vector.broadcast %2 : vector<8x1xf32> to vector<8x16xf32>
    %4 = arith.subf %0, %3 : vector<8x16xf32>
    %5 = math.exp %4 : vector<8x16xf32>
    %cst_1 = arith.constant dense<0.000000e+00> : vector<8xf32>
    %6 = vector.multi_reduction <add>, %5, %cst_1 [1] : vector<8x16xf32> to vector<8xf32>
    %7 = vector.shape_cast %6 : vector<8xf32> to vector<8x1xf32>
    %8 = arith.truncf %5 : vector<8x16xf32> to vector<8x16xbf16>
    %c0_2 = arith.constant 0 : index
    %c0_3 = arith.constant 0 : index
    %9 = vector.load %arg2[%c0_2, %c0_3] : memref<8x8xf32, #tpu.memory_space<vmem>>, vector<8x8xf32>
    %10 = arith.truncf %9 : vector<8x8xf32> to vector<8x8xbf16>
    %11 = vector.extract_strided_slice %10 {offsets = [0, 0], sizes = [8, 1], strides = [1, 1]} : vector<8x8xbf16> to vector<8x1xbf16>
    %12 = vector.broadcast %11 : vector<8x1xbf16> to vector<8x16xbf16>
    %13 = arith.mulf %8, %12 : vector<8x16xbf16>
    %14 = vector.extract_strided_slice %10 {offsets = [0, 1], sizes = [8, 1], strides = [1, 1]} : vector<8x8xbf16> to vector<8x1xbf16>
    %15 = vector.broadcast %14 : vector<8x1xbf16> to vector<8x16xbf16>
    %16 = arith.mulf %8, %15 : vector<8x16xbf16>
    %17 = vector.extract_strided_slice %10 {offsets = [0, 2], sizes = [8, 1], strides = [1, 1]} : vector<8x8xbf16> to vector<8x1xbf16>
    %18 = vector.broadcast %17 : vector<8x1xbf16> to vector<8x16xbf16>
    %19 = arith.mulf %8, %18 : vector<8x16xbf16>
    %20 = vector.extract_strided_slice %10 {offsets = [0, 3], sizes = [8, 1], strides = [1, 1]} : vector<8x8xbf16> to vector<8x1xbf16>
    %21 = vector.broadcast %20 : vector<8x1xbf16> to vector<8x16xbf16>
    %22 = arith.mulf %8, %21 : vector<8x16xbf16>
    %23 = vector.extract_strided_slice %10 {offsets = [0, 4], sizes = [8, 1], strides = [1, 1]} : vector<8x8xbf16> to vector<8x1xbf16>
    %24 = vector.broadcast %23 : vector<8x1xbf16> to vector<8x16xbf16>
    %25 = arith.mulf %8, %24 : vector<8x16xbf16>
    %26 = vector.extract_strided_slice %10 {offsets = [0, 5], sizes = [8, 1], strides = [1, 1]} : vector<8x8xbf16> to vector<8x1xbf16>
    %27 = vector.broadcast %26 : vector<8x1xbf16> to vector<8x16xbf16>
    %28 = arith.mulf %8, %27 : vector<8x16xbf16>
    %29 = vector.extract_strided_slice %10 {offsets = [0, 6], sizes = [8, 1], strides = [1, 1]} : vector<8x8xbf16> to vector<8x1xbf16>
    %30 = vector.broadcast %29 : vector<8x1xbf16> to vector<8x16xbf16>
    %31 = arith.mulf %8, %30 : vector<8x16xbf16>
    %32 = vector.extract_strided_slice %10 {offsets = [0, 7], sizes = [8, 1], strides = [1, 1]} : vector<8x8xbf16> to vector<8x1xbf16>
    %33 = vector.broadcast %32 : vector<8x1xbf16> to vector<8x16xbf16>
    %34 = arith.mulf %8, %33 : vector<8x16xbf16>
    %35 = tpu.concatenate %13, %16, %19, %22, %25, %28, %31, %34 in 1 : vector<8x16xbf16>, vector<8x16xbf16>, vector<8x16xbf16>, vector<8x16xbf16>, vector<8x16xbf16>, vector<8x16xbf16>, vector<8x16xbf16>, vector<8x16xbf16> -> vector<8x128xbf16>
    %c0_4 = arith.constant 0 : index
    %c0_5 = arith.constant 0 : index
    %36 = vector.load %arg3[%c0_4, %c0_5] : memref<8x128xbf16, #tpu.memory_space<vmem>>, vector<8x128xbf16>
    %37 = arith.mulf %36, %35 : vector<8x128xbf16>
    %38 = arith.extf %37 : vector<8x128xbf16> to vector<8x128xf32>
    %cst_6 = arith.constant dense<0.000000e+00> : vector<8xf32>
    %39 = vector.multi_reduction <add>, %38, %cst_6 [1] : vector<8x128xf32> to vector<8xf32>
    %40 = vector.shape_cast %39 : vector<8xf32> to vector<8x1xf32>
    %41 = arith.divf %40, %7 : vector<8x1xf32>
    %cst_7 = arith.constant 0.000000e+00 : f32
    %cst_8 = arith.constant 1.000000e+00 : f32
    %42 = vector.broadcast %cst_7 : f32 to vector<8x1xf32>
    %43 = arith.maximumf %42, %41 : vector<8x1xf32>
    %44 = vector.broadcast %cst_8 : f32 to vector<8x1xf32>
    %45 = arith.minimumf %44, %43 : vector<8x1xf32>
    %c8_i32 = arith.constant 8 : i32
    %46 = arith.muli %arg0, %c8_i32 : i32
    %47 = tpu.iota {dimensions = array<i32: 0>} : vector<8x1xi32>
    %48 = vector.broadcast %46 : i32 to vector<8x1xi32>
    %49 = arith.addi %48, %47 : vector<8x1xi32>
    %c19_i32 = arith.constant 19 : i32
    %50 = vector.broadcast %c19_i32 : i32 to vector<8x1xi32>
    %51 = arith.cmpi slt, %49, %50 : vector<8x1xi32>
    %cst_9 = arith.constant 0.000000e+00 : f32
    %52 = vector.broadcast %cst_9 : f32 to vector<8x1xf32>
    %53 = arith.select %51, %45, %52 : vector<8x1xi1>, vector<8x1xf32>
    %c0_10 = arith.constant 0 : index
    %c0_11 = arith.constant 0 : index
    %54 = vector.load %arg4[%c0_10, %c0_11] : memref<8x1xf32, #tpu.memory_space<vmem>>, vector<8x1xf32>
    tpu.vector_store %arg4[%c0_10, %c0_11], %53 {strides = array<i32>} : memref<8x1xf32, #tpu.memory_space<vmem>>, vector<8x1xf32>,
    return
  }
  func.func @transform_0(%arg0: i32) -> (i32, i32) {
    %c0_i32 = arith.constant 0 : i32
    %c0_i32_0 = arith.constant 0 : i32
    return %arg0, %c0_i32 : i32, i32
  }
  func.func @transform_1(%arg0: i32) -> (i32, i32) {
    %c0_i32 = arith.constant 0 : i32
    %c0_i32_0 = arith.constant 0 : i32
    return %arg0, %c0_i32 : i32, i32
  }
  func.func @transform_2(%arg0: i32) -> (i32, i32) {
    %c0_i32 = arith.constant 0 : i32
    %c0_i32_0 = arith.constant 0 : i32
    return %arg0, %c0_i32 : i32, i32
  }
  func.func @transform_3(%arg0: i32) -> (i32, i32) {
    %c0_i32 = arith.constant 0 : i32
    %c0_i32_0 = arith.constant 0 : i32
    return %arg0, %c0_i32 : i32, i32
  }
}

</mosaic_0001>

<bundles_post_ra>
// kernel: ent_in_set.1
= control target key start
LH: loop header
LB: loop body
LE: loop exit
PB: predicated region body
PF: predicated region fallthrough
CT: control target
= control target key end

     0   :  { %s484_s12 = smov 0   ;;  %s524_s0 = inlined_call_operand.vmem [shape: f32[19,16], index: 0, kind: input, shape index: {}]   ;;  %s525_s1 = inlined_call_operand.vmem [shape: f32[19,8], index: 1, kind: input, shape index: {}]   ;;  %s526_s2 = inlined_call_operand.vmem [shape: bf16[19,128], index: 2, kind: input, shape index: {}]   ;;  %s527_s3 = inlined_call_operand.vmem [shape: f32[19,1], index: 3, kind: output, shape index: {}]  }
   0x1 LB: > { %s490_s13 = sadd.s32 4294967295, %s447_s12   ;;  %p397_p0 = scmp.ge.s32.totalorder %s447_s12, 1  ;;  %s447_s12 = sphi %s484_s12, %s13_s12  }
   0x2   : > { %p154_p1 = scmp.lt.s32.totalorder %s447_s12, 4 }
   0x4   : > { %p155_p2 = pnand %p397_p0, %p154_p1 }
   0x5   : > { %p184_p3 = scmp.lt.s32.totalorder (!%p155_p2), %s490_s13, 2  ;;  %v449_v0 = vmov (!%p155_p2), 2   ;;  %v450_v1 = vmov (!%p155_p2), 1   ;;  %vm201_vm0 = vcmask (!%p155_p2), 130048   ;;  %v451_v6 = vmov (!%p155_p2), 3   ;;  %s457_s22 = smov (!%p155_p2), 96  }
   0x6   : > { %158 = sbr.rel (%p155_p2) target bundleno = 470 (0x1d6), region = 32  ;;  %429 = vset.pattern.permute.xlu1 (!%p155_p2), %v449_v0  ;;  %428 = vset.pattern.permute.xlu0 (!%p155_p2), %v450_v1  ;;  %v452_v7 = vmov (!%p155_p2), 4   ;;  %v453_v8 = vmov (!%p155_p2), 5   ;;  %v454_v9 = vmov (!%p155_p2), 6   ;;  %v455_v10 = vmov (!%p155_p2), 7   ;;  %s458_s23 = smov (!%p155_p2), 16  }
   0x7   : > { %v456_v11 = vmov (!%p155_p2), 0   ;;  %s459_s24 = smov (!%p155_p2), 32   ;;  %s460_s25 = smov (!%p155_p2), 48   ;;  %vm279_vm1 = vcmask (!%p155_p2), 261120   ;;  %vm282_vm2 = vcmask (!%p155_p2), 392192   ;;  %vm285_vm3 = vcmask (!%p155_p2), 523264  }
   0x8   : > { %s461_s26 = smov (!%p155_p2), 64   ;;  %s462_s27 = smov (!%p155_p2), 80   ;;  %vm288_vm4 = vcmask (!%p155_p2), 654336   ;;  %vm291_vm5 = vcmask (!%p155_p2), 785408   ;;  %vm294_vm6 = vcmask (!%p155_p2), 916480   ;;  %v308_v52 = vlaneseq (!%p155_p2) }
   0x9   : > { %s463_s28 = smov (!%p155_p2), 112   ;;  %s402_s6 = sshll.u32 (!%p155_p2), %s490_s13, 3  ;;  %vm314_vm8 = vcmask (!%p155_p2), 7168  }
   0xa   : > { %v309_v53 = vshrl.u32 (!%p155_p2), %v308_v52, 7  ;;  %v310_v54 = vstv (!%p155_p2), %s402_s6 }
   0xc   : > { %v311_v56 = vadd.s32 (!%p155_p2), %v310_v54, %v309_v53 }
   0xd   : > { %s496_s14 = scalar_select %p184_p3, %s490_s13, 2 }
   0xe   : > { %vm312_vm7 = vcmp.lt.s32.totalorder %v311_v56, 19 }
   0xf   : > { %s499_s15 = sshll.u32 %s496_s14, 3  ;;  %s400_s29 = sshll.u32 %s496_s14, 2 }
  0x10   : > { %s187_s18 = scalar_lea.vmem %s524_s0, %s499_s15  ;;  %s191_s21 = scalar_lea.vmem %s525_s1, %s499_s15 }
  0x11   : > { %v200_v2 = vld [vmem:[%s187_s18] sm:$0xff]  ;;  %s195_s5 = scalar_lea.vmem %s526_s2, %s400_s29  ;;  %s199_s9 = scalar_lea.vmem %s527_s3, %s499_s15 }
  0x12   : > { %v212_v3 = vld [vmem:[%s191_s21] sm:$0xff]  ;;  %v202_v4 = vsel %vm201_vm0, %v200_v2, -inf }
  0x13   : > { %v213_v5 = vpack.c.bf16 %v212_v3, %v212_v3  ;;  %203 = vmax.xlane.f32.xlu0 %v202_v4  ;;  %v298_v45 = vld [vmem:[%s195_s5] sm:$0xf] }
  0x15   : > { %226 = vperm.xlu1 %429, %v213_v5  }
  0x19   : > { %430 = vset.pattern.permute.xlu1 %v451_v6 }
  0x1a   : > { %231 = vperm.xlu1 %430, %v213_v5  }
  0x1e   : > { %431 = vset.pattern.permute.xlu1 %v452_v7 }
  0x1f   : > { %236 = vperm.xlu1 %431, %v213_v5  }
  0x23   : > { %432 = vset.pattern.permute.xlu1 %v453_v8 }
  0x24   : > { %241 = vperm.xlu1 %432, %v213_v5  }
  0x28   : > { %433 = vset.pattern.permute.xlu1 %v454_v9 }
  0x29   : > { %246 = vperm.xlu1 %433, %v213_v5   ;;  %221 = vperm.xlu0 %428, %v213_v5  }
  0x2d   : > { %434 = vset.pattern.permute.xlu1 %v455_v10  ;;  %436 = vset.pattern.permute.xlu0 %v455_v10 }
  0x2e   : > { %251 = vperm.xlu1 %434, %v213_v5  }
  0x32   : > { %435 = vset.pattern.permute.xlu1 %v456_v11 }
  0x33   : > { %216 = vperm.xlu1 %435, %v213_v5  }
  0x94   : > { %v227_v12 = vpop.permute.xlu1 %226 }
  0x99   : > { %v232_v13 = vpop.permute.xlu1 %231 }
  0x9e   : > { %v237_v17 = vpop.permute.xlu1 %236 }
  0xa0   : > { %v204_v14 = vpop.xlane.xlu0 %203 }
  0xa1   : > { %v205_v15 = vsub.f32 %v200_v2, %v204_v14 }
  0xa3   : > { %v206_v16 = vmul.f32 1.442695, %v205_v15  ;;  %v242_v18 = vpop.permute.xlu1 %241 }
  0xa5   : > { %437 = vpow2.f32 %v206_v16 }
  0xa8   : > { %v222_v21 = vpop.permute.xlu0 %221  ;;  %v247_v22 = vpop.permute.xlu1 %246 }
  0xad   : > { %v252_v29 = vpop.permute.xlu1 %251 }
  0xaf   : > { %v438_v19 = vpop.eup %437 }
  0xb0   : > { %v211_v20 = vpack.c.bf16 %v438_v19, %v438_v19  ;;  %v208_v31 = vsel %vm201_vm0, %v438_v19, 0.0 }
  0xb2   : > { %v249_v23 = vmul.bf16 %v247_v22, %v211_v20  ;;  %v224_v24 = vmul.bf16 %v222_v21, %v211_v20  ;;  %v229_v25 = vmul.bf16 %v227_v12, %v211_v20  ;;  %v234_v26 = vmul.bf16 %v232_v13, %v211_v20  ;;  %v217_v32 = vpop.permute.xlu1 %216 }
  0xb3   : > { %v239_v27 = vmul.bf16 %v237_v17, %v211_v20  ;;  %v244_v28 = vmul.bf16 %v242_v18, %v211_v20  ;;  %v254_v30 = vmul.bf16 %v252_v29, %v211_v20  ;;  %v219_v36 = vmul.bf16 %v217_v32, %v211_v20 }
  0xb4   : > { %271 = vrot.lane.b32.xlu0 %v249_v23, %s457_s22  ;;  %256 = vrot.lane.b32.xlu1 %v224_v24, %s458_s23 }
  0xb8   : > { %259 = vrot.lane.b32.xlu1 %v229_v25, %s459_s24 }
  0xbc   : > { %262 = vrot.lane.b32.xlu1 %v234_v26, %s460_s25 }
  0xc0   : > { %265 = vrot.lane.b32.xlu1 %v239_v27, %s461_s26 }
  0xc4   : > { %268 = vrot.lane.b32.xlu1 %v244_v28, %s462_s27 }
  0xc8   : > { %274 = vrot.lane.b32.xlu1 %v254_v30, %s463_s28 }
  0xd3   : > { %209 = vadd.xlane.f32.xlu0 %v208_v31 }
 0x126   : > { %v257_v33 = vpop.permute.xlu1 %256  ;;  %v272_v44 = vpop.permute.xlu0 %271 }
 0x127   : > { %v278_v38 = vsel %vm201_vm0, %v219_v36, %v257_v33 }
 0x12a   : > { %v260_v34 = vpop.permute.xlu1 %259 }
 0x12b   : > { %v281_v39 = vsel %vm279_vm1, %v278_v38, %v260_v34 }
 0x12e   : > { %v263_v35 = vpop.permute.xlu1 %262 }
 0x12f   : > { %v284_v40 = vsel %vm282_vm2, %v281_v39, %v263_v35 }
 0x132   : > { %v266_v37 = vpop.permute.xlu1 %265 }
 0x133   : > { %v287_v41 = vsel %vm285_vm3, %v284_v40, %v266_v37 }
 0x136   : > { %v269_v42 = vpop.permute.xlu1 %268 }
 0x137   : > { %v290_v43 = vsel %vm288_vm4, %v287_v41, %v269_v42 }
 0x138   : > { %v293_v47 = vsel %vm291_vm5, %v290_v43, %v272_v44 }
 0x13a   : > { %v275_v46 = vpop.permute.xlu1 %274 }
 0x13b   : > { %v296_v48 = vsel %vm294_vm6, %v293_v47, %v275_v46 }
 0x13c   : > { %v299_v49 = vmul.bf16 %v298_v45, %v296_v48 }
 0x13e   : > { %v300_v50 = vunpack.c.l.bf16 %v299_v49 }
 0x140   : > { %301 = vadd.xlane.f32.xlu1 %v300_v50 }
 0x160   : > { %v210_v51 = vpop.xlane.xlu0 %209 }
 0x161   : > { %439 = vrcp.f32 %v210_v51 }
 0x16b   : > { %v440_v55 = vpop.eup %439 }
 0x1cd   : > { %v302_v57 = vpop.xlane.xlu1 %301 }
 0x1ce   : > { %v304_v58 = vmul.f32 %v440_v55, %v302_v57 }
 0x1d0   : > { %v305_v59 = vmax.f32 %v304_v58, 0.0 }
 0x1d2   : > { %v306_v60 = vmin.f32 %v305_v59, 1.0 }
 0x1d4   : > { %v313_v61 = vsel %vm312_vm7, %v306_v60, 0.0 }
 0x1d5   : > { %315 = vst.msk [vmem:[%s199_s9] sm:$0xff] %vm314_vm8, %v313_v61 }
 0x1d6 PF: > { %s13_s12 = sadd.s32 1, %s447_s12  }
 0x1d7   : > { %p10_p4 = scmp.ge.s32.totalorder %s13_s12, 5  }
 0x1d9   :  { %12 = sbr.rel (!%p10_p4) target bundleno = 1 (0x1), region = 68 }

</bundles_post_ra>
